<compile_context>
chip_gen: v6e
topology: v6e:2x2x1
jax: 0.10.0
libtpu: 0.0.40
codegen_flags: <defaults>
</compile_context>

<pallas_src>
import functools
import math

import jax
import jax.numpy as jnp
from jax import lax
from jax.experimental import pallas as pl
from jax.experimental.pallas import tpu as pltpu

_PAD_LABEL = -(2 ** 31)  # sentinel for padded batch entries (assumed unused by real labels)


def _triplet_bh_kernel(a_row_ref, p_col_ref, p_row_ref, a_col_ref,
                       lab_i_ref, lab_j_ref, loss_ref, smax_sc, *, margin):
    j = pl.program_id(1)
    nj = pl.num_programs(1)

    a_i = a_row_ref[...]          # (tm, Dp)  anchor rows of this row-tile
    p_j = p_col_ref[...]          # (tn, Dp)  positive rows of this col-tile
    p_i = p_row_ref[...]          # (tm, Dp)  positive rows of this row-tile
    a_j = a_col_ref[...]          # (tn, Dp)  anchor rows of this col-tile
    lab_i = lab_i_ref[...]        # (tm, 1) int32
    lab_j = lab_j_ref[...]        # (1, tn) int32

    # Raw similarities on the MXU (f32 accumulation).  The distance map
    # dist = 2 - 2*sim is applied once per (tm,1) vector in the epilogue, not on
    # full (tm,tn) tiles.  sim2 supplies the column-min of the distance matrix as
    # a row reduction, so no NxN transpose is ever formed.
    s1 = lax.dot_general(a_i, p_j, (((1,), (1,)), ((), ())),
                         preferred_element_type=jnp.float32)      # (tm, tn) <a_i, p_j>
    s2 = lax.dot_general(p_i, a_j, (((1,), (1,)), ((), ())),
                         preferred_element_type=jnp.float32)      # (tm, tn) <p_i, a_j>

    # negatives: different label AND not a padded column.  dist = 2 - 2*sim is
    # monotone decreasing, so min_j min(d1,d2) == 2 - 2*max_j max(s1,s2); one
    # fused masked-max stream (fill = -1 <-> dist 4) replaces two masked-min
    # streams (fill = 4) and is exactly equivalent to the reference.
    mask_neg = jnp.logical_and(lab_i != lab_j, lab_j != jnp.int32(_PAD_LABEL))
    smax = jnp.max(jnp.where(mask_neg, jnp.maximum(s1, s2), jnp.float32(-1.0)),
                   axis=1, keepdims=True)                          # (tm, 1)

    @pl.when(j == 0)
    def _():
        smax_sc[...] = smax

    @pl.when(j > 0)
    def _():
        smax_sc[...] = jnp.maximum(smax_sc[...], smax)

    @pl.when(j == nj - 1)
    def _():
        two = jnp.float32(2.0)
        # positive-pair distance: elementwise over the row tile, no NxN diag.
        dist_pos = two - two * jnp.sum(
            a_i.astype(jnp.float32) * p_i.astype(jnp.float32), axis=1, keepdims=True)
        hard_neg = two - two * smax_sc[...]                        # (tm, 1)
        loss_ref[...] = jnp.maximum(dist_pos - hard_neg + jnp.float32(margin), 0.0)


def _rup(x, m):
    return ((x + m - 1) // m) * m


def _vmem_limit_bytes():
    """Generation-aware VMEM budget: ~3/4 of physical, capped at 96 MiB.
    v7x (64 MiB physical) -> 48 MiB; v5e/v6e (128 MiB) -> 96 MiB."""
    try:
        cap = int(pltpu.get_tpu_info().vmem_capacity_bytes)
    except Exception:
        cap = 64 * 1024 * 1024  # conservative (v7x-sized) fallback
    return min((cap * 3) // 4, 96 * 1024 * 1024)


def _choose_tiling(n, dp, itemsize, vmem_budget):
    """Pick (np_, tm, tn) with np_ % tm == 0 and np_ % tn == 0.

      * row tiles: <= 512 rows, and >= 2 tiles when n > 128 so the 'parallel'
        grid axis can be sharded across v7x's two TensorCores,
      * col tiles (streamed reduction axis): <= 1024 rows so a grid step moves
        >= ~1 MiB (amortizes the ~0.35 us/step overhead); multiples of 128
        whenever the column axis is actually split (lane-dense label row-block),
      * shrink col tiles first, then row tiles, until the double-buffered block
        footprint fits the VMEM budget.
    """
    align = 8 * (4 // itemsize)          # f32 -> 8 rows, bf16 -> 16 rows (sublane packing)

    if n <= 128:
        t = _rup(max(n, align), align)
        return t, t, t

    n0 = _rup(n, align)
    ni = max(2, -(-n0 // 512))
    nj = max(1, -(-n0 // 1024))

    def pad(ni_, nj_):
        m = align * ni_
        if nj_ > 1:
            c = 128 * nj_
            m = m * c // math.gcd(m, c)  # lcm
        return _rup(n, m)

    def fits(ni_, nj_):
        np_ = pad(ni_, nj_)
        tm, tn = np_ // ni_, np_ // nj_
        # a_row + p_row + p_col + a_col blocks, each double-buffered
        return 4 * (tm + tn) * dp * itemsize <= vmem_budget

    while not fits(ni, nj) and pad(ni, nj * 2) // (nj * 2) >= 256:
        nj *= 2
    while not fits(ni, nj) and pad(ni * 2, nj) // (ni * 2) >= 128:
        ni *= 2

    np_ = pad(ni, nj)
    return np_, np_ // ni, np_ // nj


def triplet_loss_batch_hard(anchor, positive, label, margin=0.1, size_average=True,
                            compute_dtype=jnp.float32, block_rows=None, block_cols=None):
    """Triplet loss with batch-hard negative mining (matches the PyTorch module).

    anchor, positive: (N, D) l2-normalized embeddings; label: (N,) int.
    compute_dtype=jnp.bfloat16 is the recommended production setting: it halves
    DMA bytes / VMEM for all embedding blocks and feeds the MXU natively on
    v5e/v6e/v7x (f32 accumulation is always used); default stays f32 for
    bit-tight parity with the f32 reference.
    block_rows/block_cols optionally force the row/col tile sizes (testing).
    """
    n, d = anchor.shape
    itemsize = jnp.dtype(compute_dtype).itemsize
    dp = _rup(d, 128)                      # lane-dense feature dim, full MXU K
    vmem_limit = _vmem_limit_bytes()

    if block_rows is not None and block_cols is not None:
        tm, tn = int(block_rows), int(block_cols)
        np_ = _rup(n, tm * tn // math.gcd(tm, tn))
        assert tm % 8 == 0 and tn % 8 == 0
        assert np_ // tn == 1 or tn % 128 == 0, "split column tiles must be multiples of 128"
    else:
        np_, tm, tn = _choose_tiling(n, dp, itemsize, (vmem_limit * 3) // 4)
    grid = (np_ // tm, np_ // tn)

    # zero padding of features preserves inner products; padded rows get a
    # sentinel label so they never count as negatives.
    a = jnp.zeros((np_, dp), compute_dtype).at[:n, :d].set(anchor.astype(compute_dtype))
    p = jnp.zeros((np_, dp), compute_dtype).at[:n, :d].set(positive.astype(compute_dtype))
    labp = jnp.full((np_,), _PAD_LABEL, jnp.int32).at[:n].set(label.astype(jnp.int32))
    lab_col = labp.reshape(np_, 1)
    lab_row = labp.reshape(1, np_)

    kernel = functools.partial(_triplet_bh_kernel, margin=float(margin))

    losses = pl.pallas_call(
        kernel,
        out_shape=jax.ShapeDtypeStruct((np_, 1), jnp.float32),
        grid_spec=pltpu.PrefetchScalarGridSpec(
            num_scalar_prefetch=0,
            grid=grid,
            in_specs=[
                pl.BlockSpec((tm, dp), lambda i, j: (i, 0)),   # anchor,   row tile
                pl.BlockSpec((tn, dp), lambda i, j: (j, 0)),   # positive, col tile (streamed)
                pl.BlockSpec((tm, dp), lambda i, j: (i, 0)),   # positive, row tile
                pl.BlockSpec((tn, dp), lambda i, j: (j, 0)),   # anchor,   col tile (streamed)
                pl.BlockSpec((tm, 1), lambda i, j: (i, 0)),    # labels (column vector)
                pl.BlockSpec((1, tn), lambda i, j: (0, j)),    # labels (row vector)
            ],
            out_specs=pl.BlockSpec((tm, 1), lambda i, j: (i, 0)),
            scratch_shapes=[pltpu.VMEM((tm, 1), jnp.float32)],  # running max-similarity
        ),
        compiler_params=pltpu.CompilerParams(
            dimension_semantics=("parallel", "arbitrary"),
            vmem_limit_bytes=vmem_limit,
        ),
    )(a, p, p, a, lab_col, lab_row)

    # trivial epilogue: drop padded rows, reduce (kept outside the kernel so the
    # row axis stays 'parallel' / megacore-shardable)
    losses = losses[:n, 0]
    return losses.mean() if size_average else losses.sum()


def _reference(anchor, positive, label, margin=0.1, size_average=True):
    n = anchor.shape[0]
    dist = 2.0 - 2.0 * anchor @ positive.T
    dist_pos = jnp.diag(dist)
    lab = label.reshape(n, 1)
    mask_neg = lab != lab.T
    dm = jnp.where(mask_neg, dist, 4.0)
    hard = jnp.minimum(jnp.min(dm, axis=1), jnp.min(dm, axis=0))
    losses = jax.nn.relu(dist_pos - hard + margin)
    return losses.mean() if size_average else losses.sum()


if __name__ == "__main__":
    key = jax.random.PRNGKey(0)

    def make_inputs(n, d, k):
        k1, k2, k3 = jax.random.split(k, 3)
        a = jax.random.normal(k1, (n, d), jnp.float32)
        p = jax.random.normal(k2, (n, d), jnp.float32)
        a = a / jnp.linalg.norm(a, axis=1, keepdims=True)   # module assumes l2-normalized inputs
        p = p / jnp.linalg.norm(p, axis=1, keepdims=True)
        lab = jax.random.randint(k3, (n,), 0, 3, jnp.int32)
        return a, p, lab

    cases = [
        # (n, d, size_average, compute_dtype, block_rows, block_cols, tol)
        (8,   32, True,  jnp.float32,  None, None, 1e-4),
        (6,   40, False, jnp.float32,  None, None, 1e-4),
        (200, 96, True,  jnp.float32,  128,  128,  1e-4),   # 2x2 grid: running max + 2 row tiles
        (8,   32, True,  jnp.bfloat16, None, None, 5e-2),   # recommended production dtype
    ]
    for (n, d, size_average, cdt, br, bc, tol) in cases:
        key, sub = jax.random.split(key)
        a, p, lab = make_inputs(n, d, sub)
        out = triplet_loss_batch_hard(a, p, lab, margin=0.1, size_average=size_average,
                                      compute_dtype=cdt, block_rows=br, block_cols=bc)
        out = jax.block_until_ready(out)
        ref = _reference(a, p, lab, margin=0.1, size_average=size_average)
        assert jnp.allclose(out, ref, atol=tol, rtol=tol), (n, d, str(cdt), out, ref)

    print("KERNEL_OK")
</pallas_src>

<mosaic_0001>
module attributes {stable_mosaic.version = 11 : i64} {
  func.func @_triplet_bh_kernel(%arg0: i32, %arg1: i32, %arg2: memref<8x128xf32, #tpu.memory_space<vmem>>, %arg3: memref<8x128xf32, #tpu.memory_space<vmem>>, %arg4: memref<8x128xf32, #tpu.memory_space<vmem>>, %arg5: memref<8x128xf32, #tpu.memory_space<vmem>>, %arg6: memref<8x1xi32, #tpu.memory_space<vmem>>, %arg7: memref<1x8xi32, #tpu.memory_space<vmem>>, %arg8: memref<8x1xf32, #tpu.memory_space<vmem>>, %arg9: memref<8x1xf32, #tpu.memory_space<vmem>>) attributes {dimension_semantics = [#tpu.dimension_semantics<parallel>, #tpu.dimension_semantics<arbitrary>], iteration_bounds = array<i64: 1, 1>, scalar_prefetch = 0 : i64, scratch_operands = 1 : i64, tpu.core_type = #tpu.core_type<tc>, window_params = [{transform_indices = @transform_0, window_bounds = array<i64: 8, 128>}, {transform_indices = @transform_1, window_bounds = array<i64: 8, 128>}, {transform_indices = @transform_2, window_bounds = array<i64: 8, 128>}, {transform_indices = @transform_3, window_bounds = array<i64: 8, 128>}, {transform_indices = @transform_4, window_bounds = array<i64: 8, 1>}, {transform_indices = @transform_5, window_bounds = array<i64: 1, 8>}, {transform_indices = @transform_6, window_bounds = array<i64: 8, 1>}]} {
    %c0 = arith.constant 0 : index
    %c0_0 = arith.constant 0 : index
    %0 = vector.load %arg2[%c0, %c0_0] : memref<8x128xf32, #tpu.memory_space<vmem>>, vector<8x128xf32>
    %c0_1 = arith.constant 0 : index
    %c0_2 = arith.constant 0 : index
    %1 = vector.load %arg3[%c0_1, %c0_2] : memref<8x128xf32, #tpu.memory_space<vmem>>, vector<8x128xf32>
    %c0_3 = arith.constant 0 : index
    %c0_4 = arith.constant 0 : index
    %2 = vector.load %arg4[%c0_3, %c0_4] : memref<8x128xf32, #tpu.memory_space<vmem>>, vector<8x128xf32>
    %c0_5 = arith.constant 0 : index
    %c0_6 = arith.constant 0 : index
    %3 = vector.load %arg5[%c0_5, %c0_6] : memref<8x128xf32, #tpu.memory_space<vmem>>, vector<8x128xf32>
    %c0_7 = arith.constant 0 : index
    %c0_8 = arith.constant 0 : index
    %4 = vector.load %arg6[%c0_7, %c0_8] : memref<8x1xi32, #tpu.memory_space<vmem>>, vector<8x1xi32>
    %c0_9 = arith.constant 0 : index
    %c0_10 = arith.constant 0 : index
    %5 = vector.load %arg7[%c0_9, %c0_10] : memref<1x8xi32, #tpu.memory_space<vmem>>, vector<1x8xi32>
    %cst = arith.constant dense<0.000000e+00> : vector<8x8xf32>
    %6 = tpu.matmul %0, %1, %cst {dimension_numbers = #tpu.dot_dimension_numbers<[1], [1], [0], [0], [0, 0, 1, 0], [], []>} : vector<8x128xf32>, vector<8x128xf32>, vector<8x8xf32> -> vector<8x8xf32>
    %cst_11 = arith.constant dense<0.000000e+00> : vector<8x8xf32>
    %7 = tpu.matmul %2, %3, %cst_11 {dimension_numbers = #tpu.dot_dimension_numbers<[1], [1], [0], [0], [0, 0, 1, 0], [], []>} : vector<8x128xf32>, vector<8x128xf32>, vector<8x8xf32> -> vector<8x8xf32>
    %8 = vector.broadcast %4 : vector<8x1xi32> to vector<8x8xi32>
    %9 = vector.broadcast %5 : vector<1x8xi32> to vector<8x8xi32>
    %10 = arith.cmpi ne, %8, %9 : vector<8x8xi32>
    %c-2147483648_i32 = arith.constant -2147483648 : i32
    %11 = vector.broadcast %c-2147483648_i32 : i32 to vector<1x8xi32>
    %12 = arith.cmpi ne, %5, %11 : vector<1x8xi32>
    %13 = vector.broadcast %12 : vector<1x8xi1> to vector<8x8xi1>
    %14 = arith.andi %10, %13 : vector<8x8xi1>
    %15 = arith.maximumf %6, %7 : vector<8x8xf32>
    %cst_12 = arith.constant -1.000000e+00 : f32
    %16 = vector.broadcast %cst_12 : f32 to vector<8x8xf32>
    %17 = arith.select %14, %15, %16 : vector<8x8xi1>, vector<8x8xf32>
    %cst_13 = arith.constant dense<0xFF800000> : vector<8xf32>
    %18 = vector.multi_reduction <maximumf>, %17, %cst_13 [1] : vector<8x8xf32> to vector<8xf32>
    %19 = vector.shape_cast %18 : vector<8xf32> to vector<8x1xf32>
    %c0_i32 = arith.constant 0 : i32
    %20 = arith.cmpi eq, %arg1, %c0_i32 : i32
    %21 = arith.extui %20 : i1 to i32
    %c0_i32_14 = arith.constant 0 : i32
    %22 = arith.cmpi ne, %21, %c0_i32_14 : i32
    scf.if %22 {
      %c0_19 = arith.constant 0 : index
      %c0_20 = arith.constant 0 : index
      %29 = vector.load %arg9[%c0_19, %c0_20] : memref<8x1xf32, #tpu.memory_space<vmem>>, vector<8x1xf32>
      tpu.vector_store %arg9[%c0_19, %c0_20], %19 {strides = array<i32>} : memref<8x1xf32, #tpu.memory_space<vmem>>, vector<8x1xf32>,
    } else {
    }
    %c0_i32_15 = arith.constant 0 : i32
    %23 = arith.cmpi sgt, %arg1, %c0_i32_15 : i32
    %24 = arith.extui %23 : i1 to i32
    %c0_i32_16 = arith.constant 0 : i32
    %25 = arith.cmpi ne, %24, %c0_i32_16 : i32
    scf.if %25 {
      %c0_19 = arith.constant 0 : index
      %c0_20 = arith.constant 0 : index
      %29 = vector.load %arg9[%c0_19, %c0_20] : memref<8x1xf32, #tpu.memory_space<vmem>>, vector<8x1xf32>
      %30 = arith.maximumf %29, %19 : vector<8x1xf32>
      %c0_21 = arith.constant 0 : index
      %c0_22 = arith.constant 0 : index
      %31 = vector.load %arg9[%c0_21, %c0_22] : memref<8x1xf32, #tpu.memory_space<vmem>>, vector<8x1xf32>
      tpu.vector_store %arg9[%c0_21, %c0_22], %30 {strides = array<i32>} : memref<8x1xf32, #tpu.memory_space<vmem>>, vector<8x1xf32>,
    } else {
    }
    %c0_i32_17 = arith.constant 0 : i32
    %26 = arith.cmpi eq, %arg1, %c0_i32_17 : i32
    %27 = arith.extui %26 : i1 to i32
    %c0_i32_18 = arith.constant 0 : i32
    %28 = arith.cmpi ne, %27, %c0_i32_18 : i32
    scf.if %28 {
      %29 = arith.mulf %0, %2 : vector<8x128xf32>
      %cst_19 = arith.constant dense<0.000000e+00> : vector<8xf32>
      %30 = vector.multi_reduction <add>, %29, %cst_19 [1] : vector<8x128xf32> to vector<8xf32>
      %31 = vector.shape_cast %30 : vector<8xf32> to vector<8x1xf32>
      %cst_20 = arith.constant 2.000000e+00 : f32
      %32 = vector.broadcast %cst_20 : f32 to vector<8x1xf32>
      %33 = arith.mulf %32, %31 : vector<8x1xf32>
      %cst_21 = arith.constant 2.000000e+00 : f32
      %34 = vector.broadcast %cst_21 : f32 to vector<8x1xf32>
      %35 = arith.subf %34, %33 : vector<8x1xf32>
      %c0_22 = arith.constant 0 : index
      %c0_23 = arith.constant 0 : index
      %36 = vector.load %arg9[%c0_22, %c0_23] : memref<8x1xf32, #tpu.memory_space<vmem>>, vector<8x1xf32>
      %cst_24 = arith.constant 2.000000e+00 : f32
      %37 = vector.broadcast %cst_24 : f32 to vector<8x1xf32>
      %38 = arith.mulf %37, %36 : vector<8x1xf32>
      %cst_25 = arith.constant 2.000000e+00 : f32
      %39 = vector.broadcast %cst_25 : f32 to vector<8x1xf32>
      %40 = arith.subf %39, %38 : vector<8x1xf32>
      %41 = arith.subf %35, %40 : vector<8x1xf32>
      %cst_26 = arith.constant 1.000000e-01 : f32
      %42 = vector.broadcast %cst_26 : f32 to vector<8x1xf32>
      %43 = arith.addf %41, %42 : vector<8x1xf32>
      %cst_27 = arith.constant 0.000000e+00 : f32
      %44 = vector.broadcast %cst_27 : f32 to vector<8x1xf32>
      %45 = arith.maximumf %43, %44 : vector<8x1xf32>
      %c0_28 = arith.constant 0 : index
      %c0_29 = arith.constant 0 : index
      %46 = vector.load %arg8[%c0_28, %c0_29] : memref<8x1xf32, #tpu.memory_space<vmem>>, vector<8x1xf32>
      tpu.vector_store %arg8[%c0_28, %c0_29], %45 {strides = array<i32>} : memref<8x1xf32, #tpu.memory_space<vmem>>, vector<8x1xf32>,
    } else {
    }
    return
  }
  func.func @transform_0(%arg0: i32, %arg1: i32) -> (i32, i32) {
    %c0_i32 = arith.constant 0 : i32
    %c0_i32_0 = arith.constant 0 : i32
    return %arg0, %c0_i32 : i32, i32
  }
  func.func @transform_1(%arg0: i32, %arg1: i32) -> (i32, i32) {
    %c0_i32 = arith.constant 0 : i32
    %c0_i32_0 = arith.constant 0 : i32
    return %arg1, %c0_i32 : i32, i32
  }
  func.func @transform_2(%arg0: i32, %arg1: i32) -> (i32, i32) {
    %c0_i32 = arith.constant 0 : i32
    %c0_i32_0 = arith.constant 0 : i32
    return %arg0, %c0_i32 : i32, i32
  }
  func.func @transform_3(%arg0: i32, %arg1: i32) -> (i32, i32) {
    %c0_i32 = arith.constant 0 : i32
    %c0_i32_0 = arith.constant 0 : i32
    return %arg1, %c0_i32 : i32, i32
  }
  func.func @transform_4(%arg0: i32, %arg1: i32) -> (i32, i32) {
    %c0_i32 = arith.constant 0 : i32
    %c0_i32_0 = arith.constant 0 : i32
    return %arg0, %c0_i32 : i32, i32
  }
  func.func @transform_5(%arg0: i32, %arg1: i32) -> (i32, i32) {
    %c0_i32 = arith.constant 0 : i32
    %c0_i32_0 = arith.constant 0 : i32
    return %c0_i32, %arg1 : i32, i32
  }
  func.func @transform_6(%arg0: i32, %arg1: i32) -> (i32, i32) {
    %c0_i32 = arith.constant 0 : i32
    %c0_i32_0 = arith.constant 0 : i32
    return %arg0, %c0_i32 : i32, i32
  }
}

</mosaic_0001>

<bundles_post_ra>
// kernel: tpu_custom_call.1
= control target key start
LH: loop header
LB: loop body
LE: loop exit
PB: predicated region body
PF: predicated region fallthrough
CT: control target
= control target key end

     0   :  { %11 = vsyncpa [#allocation4], 0  ;;  %s409_s0 = inlined_call_operand.vmem [shape: f32[8,128], index: 0, kind: input, shape index: {}]   ;;  %s410_s1 = inlined_call_operand.hbm [shape: f32[8,128], index: 1, kind: input, shape index: {}]   ;;  %s411_s2 = inlined_call_operand.hbm [shape: f32[8,128], index: 2, kind: input, shape index: {}]   ;;  %s412_s3 = inlined_call_operand.hbm [shape: f32[8,128], index: 3, kind: input, shape index: {}]   ;;  %s413_s4 = inlined_call_operand.vmem [shape: s32[8,1], index: 4, kind: input, shape index: {}]   ;;  %s414_s5 = inlined_call_operand.vmem [shape: s32[1,8], index: 5, kind: input, shape index: {}]   ;;  %s415_s6 = inlined_call_operand.vmem [shape: f32[8,1], index: 6, kind: output, shape index: {}]  }
   0x1   :  { %12 = vsyncpa [#allocation6], 0  ;;  %s347_s21 = smov [#allocation5]   ;;  %s348_s23 = smov [#allocation3]  }
   0x2   :  { %s31_s22 = sshll.u32 %s347_s21, 4  ;;  %s21_s24 = sshll.u32 %s348_s23, 4  ;;  %s32_s22 = int_to_ptr.vmem [resolvable:$true] %s31_s22  ;;  %s22_s24 = int_to_ptr.vmem [resolvable:$true] %s21_s24 }
   0x3   :  { %s291_s25 = scalar_lea.vmem %s32_s22, 128  ;;  %p296_p1 = scmp.lt.s32.totalorder %s32_s22, %s32_s22 }
   0x4   :  { %p292_p0 = scmp.ne.s32.totalorder %s32_s22, %s291_s25  ;;  %p297_p2 = scmp.lt.s32.totalorder %s291_s25, %s291_s25 }
   0x6   :  { %p298_p3 = por %p297_p2, %p296_p1 }
   0x8   :  { %p299_p4 = pnand %p298_p3, %p292_p0 }
   0xa   :  { %302 = shalt.err (!%p299_p4)
}
   0xb   :  { %34 = dma.hbm_to_vmem [thread:$0]  %s411_s2, 128, %s32_s22, [#allocation6]  }
   0xc   :  { %s311_s28 = scalar_lea.vmem %s22_s24, 128  ;;  %p316_p6 = scmp.lt.s32.totalorder %s22_s24, %s22_s24 }
   0xd   :  { %p312_p5 = scmp.ne.s32.totalorder %s22_s24, %s311_s28  ;;  %p317_p7 = scmp.lt.s32.totalorder %s311_s28, %s311_s28 }
   0xf   :  { %p318_p8 = por %p317_p7, %p316_p6 }
  0x11   :  { %p319_p9 = pnand %p318_p8, %p312_p5 }
  0x13   :  { %322 = shalt.err (!%p319_p9)
}
  0x14   :  { %24 = dma.hbm_to_vmem [thread:$0]  %s410_s1, 128, %s22_s24, [#allocation4]  }
  0x15   :  { %s349_s7 = smov [#allocation7]  }
  0x16   :  { %s41_s8 = sshll.u32 %s349_s7, 4  ;;  %s42_s8 = int_to_ptr.vmem [resolvable:$true] %s41_s8 }
  0x17   :  { %s331_s9 = scalar_lea.vmem %s42_s8, 128  ;;  %p336_p11 = scmp.lt.s32.totalorder %s42_s8, %s42_s8 }
  0x18   :  { %p332_p10 = scmp.ne.s32.totalorder %s42_s8, %s331_s9  ;;  %p337_p12 = scmp.lt.s32.totalorder %s331_s9, %s331_s9 }
  0x1a   :  { %p338_p13 = por %p337_p12, %p336_p11 }
  0x1c   :  { %p339_p0 = pnand %p338_p13, %p332_p10 }
  0x1e   :  { %342 = shalt.err (!%p339_p0)
}
  0x1f   :  { %44 = dma.hbm_to_vmem [thread:$0]  %s412_s3, 128, %s42_s8, [#allocation6]  }
  0x20   :  { %343 = dma.done.wait [#allocation4], 128  }
  0x21   :  { %344 = vsyncadd [#allocation4], 4294967168 }
  0x22   :  { %345 = dma.done.wait [#allocation6], 256  }
  0x23   :  { %346 = vsyncadd [#allocation6], 4294967040  ;;  %v350_v0 = vmov 0.0   ;;  %vm351_vm0 = vmmov 0   ;;  %v352_v1 = vmov 0   ;;  %v59_v2 = vld [vmem:[#allocation3] sm:$0xff]  ;;  %v207_v8 = vlaneseq }
  0x24   :  { %266 = vmatprep.subr.mxu0 %v350_v0  ;;  %271 = vmatprep.subr.mxu1 %v350_v0  ;;  %v61_v3 = vld [vmem:[#allocation7] sm:$0xff]  ;;  %v58_v4 = vld [vmem:[%s409_s0] sm:$0xff]  ;;  %v60_v5 = vld [vmem:[#allocation5] sm:$0xff]  ;;  %vm222_vm5 = vcmask 64512   ;;  %vm230_vm6 = vcmask 7168  }
  0x25   :  { %268 = vmatprep.mubr.msk.f32.mxu0 %vm351_vm0, %v350_v0  ;;  %273 = vmatprep.mubr.msk.f32.mxu1 %vm351_vm0, %v350_v0  ;;  %v62_v6 = vld [vmem:[%s413_s4] sm:$0xff]  ;;  %v243_v7 = vmul.f32 %v60_v5, %v58_v4  ;;  %v208_v10 = vshrl.u32 %v207_v8, 7 }
  0x26   :  { %282 = vset.pattern.permute.xlu0 %v352_v1  ;;  %267 = vmatpush3.xpose.msra.mxu0 %v59_v2  ;;  %v63_v9 = vld [vmem:[%s414_s5] sm:$0x1] }
  0x27   :  { %272 = vmatpush3.xpose.msra.mxu1 %v61_v3  ;;  %205 = vperm.xlu0 %282, %v62_v6   ;;  %vm212_vm1 = vcmp.ne.s32.totalorder %v63_v9, 2147483648  ;;  %v209_v11 = vsub.s32 0, %v208_v10 }
  0x28   :  { %244 = vadd.xlane.f32.xlu1 %v243_v7  ;;  %v213_v12 = vsel %vm212_vm1, 1, %v352_v1 }
  0x29   :  { %269 = vmatmul.mubr.f32.vlgmr.msra.gmra.mxu0 %v58_v4  ;;  %v217_v13 = vrot.slane %v213_v12, %v209_v11  ;;  %v210_v14 = vrot.slane %v63_v9, %v209_v11 }
  0x2a   :  { %274 = vmatmul.mubr.f32.vlgmr.msra.gmra.mxu1 %v60_v5 }
  0x2b   :  { %vm218_vm2 = vcmp.eq.s32.totalorder %v217_v13, 1 }
  0xa2   :  { %v206_v15 = vpop.permute.xlu0 %205 }
  0xa3   :  { %vm211_vm3 = vcmp.ne.s32.totalorder %v206_v15, %v210_v14 }
  0xa4   :  { %vm219_vm4 = vmand %vm211_vm3, %vm218_vm2 }
  0xb1   :  { %v245_v24 = vpop.xlane.xlu1 %244 }
  0xb2   :  { %v246_v25 = vmul.f32 2.0, %v245_v24 }
  0xb4   :  { %v247_v27 = vsub.f32 2.0, %v246_v25 }
  0xe9   :  { %v130_v16 = vpop.f32.mrf.mxu0 }
  0xea   :  { %v200_v17 = vpop.f32.mrf.mxu1 }
  0xeb   :  { %v220_v18 = vmax.f32 %v130_v16, %v200_v17  ;;  %v270_v19 = vpop.f32.mrf.mxu0 }
  0xec   :  { %v275_v20 = vpop.f32.mrf.mxu1 }
  0xed   :  { %v221_v21 = vsel %vm219_vm4, %v220_v18, -1.0 }
  0xee   :  { %v223_v22 = vsel %vm222_vm5, %v221_v21, -inf }
  0xef   :  { %224 = vmax.xlane.f32.xlu0 %v223_v22 }
 0x178   :  { %v225_v23 = vpop.xlane.xlu0 %224 }
 0x179   :  { %231 = vst.msk [vmem:[#allocation2] sm:$0xff] %vm230_vm6, %v225_v23 }
 0x180   :  { %v248_v26 = vld [vmem:[#allocation2] sm:$0xff] }
 0x181   :  { %v249_v28 = vmul.f32 2.0, %v248_v26 }
 0x183   :  { %v250_v29 = vsub.f32 2.0, %v249_v28 }
 0x185   :  { %v251_v30 = vsub.f32 %v247_v27, %v250_v29 }
 0x187   :  { %v252_v31 = vadd.f32 0.1, %v251_v30 }
 0x189   :  { %v253_v32 = vmax.f32 %v252_v31, 0.0 }
 0x18b   :  { %255 = vst.msk [vmem:[%s415_s6] sm:$0xff] %vm230_vm6, %v253_v32 }
 0x18c   :  { %260 = vsyncpa [#allocation4], 1 }
 0x18d   :  { %261 = vsyncpa [#allocation6], 1 }

</bundles_post_ra>
